<compile_context>
chip_gen: v7x
topology: tpu7x:2x2x1
jax: 0.10.0
libtpu: 0.0.40
codegen_flags: <defaults>
</compile_context>

<pallas_src>
import numpy as np
import jax
import jax.numpy as jnp
from jax.experimental import pallas as pl
from jax.experimental.pallas import tpu as pltpu

_LANES = 128      # vreg lane width
_SUBLANES = 8     # f32 sublane count
_F32_BYTES = 4


def random_coefficients_kernel(xi_ref, o_ref):
    # xi_ref holds (one or more identical copies of) the packed parameter row.
    # Fill the output block by sublane-broadcasting the first row; the source
    # is lane-dense, so this is a plain vreg replication that hides under the
    # HBM writeback DMA.
    o_ref[...] = jnp.broadcast_to(xi_ref[0:1, :], o_ref.shape)


def _block_rows(block_bytes, row_bytes):
    # Largest multiple of 8 rows fitting in ~block_bytes (at least 8).
    return max(_SUBLANES, (block_bytes // row_bytes) // _SUBLANES * _SUBLANES)


def random_coefficients_forward(xi, input_size, *, block_bytes=8 * 1024 * 1024):
    """Pallas equivalent of random_coefficients.forward(input_size):
    tile the [1, nkl] parameter xi to [input_size, nkl] (fp32)."""
    nkl = xi.shape[1]
    xi = xi.astype(jnp.float32)

    compiler_params = pltpu.CompilerParams(
        dimension_semantics=("parallel",),          # v7x: both TCs share the grid
        vmem_limit_bytes=32 * 1024 * 1024,          # covers 2 x 8 MiB output bufs on v5e too
    )

    lane_dense = (_LANES % nkl == 0) and ((input_size * nkl) % _LANES == 0)

    if lane_dense:
        # Repack: each 128-lane packed row holds (128 // nkl) logical rows.
        reps = _LANES // nkl
        packed_rows = (input_size * nkl) // _LANES
        xi_tile = jnp.tile(xi, (_SUBLANES, reps))   # (8, 128), all rows identical

        tm = _block_rows(block_bytes, _LANES * _F32_BYTES)
        if packed_rows <= tm:
            tm = packed_rows                        # full-array block is always legal
        grid = (pl.cdiv(packed_rows, tm),)

        cost = pl.CostEstimate(
            flops=0, transcendentals=0,
            bytes_accessed=int((xi_tile.size + packed_rows * _LANES) * _F32_BYTES),
        )

        out_packed = pl.pallas_call(
            random_coefficients_kernel,
            out_shape=jax.ShapeDtypeStruct((packed_rows, _LANES), jnp.float32),
            grid=grid,
            in_specs=[pl.BlockSpec((_SUBLANES, _LANES), lambda i: (0, 0))],  # VMEM-resident
            out_specs=pl.BlockSpec((tm, _LANES), lambda i: (i, 0)),
            compiler_params=compiler_params,
            cost_estimate=cost,
        )(xi_tile)
        # Row-major contiguous -> metadata-only reshape back to the module's shape.
        return out_packed.reshape(input_size, nkl)

    # Fallback for shapes that cannot be repacked to 128 lanes.
    tm = _block_rows(block_bytes, max(nkl, 1) * _F32_BYTES)
    if input_size <= tm:
        tm = input_size
    grid = (pl.cdiv(input_size, tm),)

    cost = pl.CostEstimate(
        flops=0, transcendentals=0,
        bytes_accessed=int((nkl + input_size * nkl) * _F32_BYTES),
    )

    return pl.pallas_call(
        random_coefficients_kernel,
        out_shape=jax.ShapeDtypeStruct((input_size, nkl), jnp.float32),
        grid=grid,
        in_specs=[pl.BlockSpec((1, nkl), lambda i: (0, 0))],                 # VMEM-resident
        out_specs=pl.BlockSpec((tm, nkl), lambda i: (i, 0)),
        compiler_params=compiler_params,
        cost_estimate=cost,
    )(xi)


def random_coefficients_reference(xi, input_size):
    # pure-JAX reference: torch's xi.repeat(input_size, 1)
    return jnp.tile(xi.astype(jnp.float32), (input_size, 1))


if __name__ == "__main__":
    key = jax.random.PRNGKey(0)

    # Module spec: xi is a [1, nkl] parameter; forward(input_size) tiles it to
    # [input_size, nkl].  The module initializes xi to zeros; use random
    # values here (as if trained) so the broadcast is actually verified.
    nkl = 16
    xi = jax.random.normal(key, (1, nkl), jnp.float32)

    # Case 1: small single lane-dense block (input_size * nkl == 128).
    input_size = 8
    out = jax.block_until_ready(random_coefficients_forward(xi, input_size))
    np.testing.assert_allclose(np.asarray(out),
                               np.asarray(random_coefficients_reference(xi, input_size)),
                               rtol=1e-6, atol=1e-6)

    # Case 2: multi-step lane-dense grid with a tail block
    # (packed_rows = 50, tm = 8 -> 7 grid steps, last one partial).
    out2 = jax.block_until_ready(
        random_coefficients_forward(xi, 400, block_bytes=8 * 512))
    np.testing.assert_allclose(np.asarray(out2),
                               np.asarray(random_coefficients_reference(xi, 400)),
                               rtol=1e-6, atol=1e-6)

    # Case 3: fallback path for shapes that cannot be repacked to 128 lanes.
    xi3 = jax.random.normal(jax.random.PRNGKey(0), (1, 10), jnp.float32)
    out3 = jax.block_until_ready(random_coefficients_forward(xi3, 7))
    np.testing.assert_allclose(np.asarray(out3),
                               np.asarray(random_coefficients_reference(xi3, 7)),
                               rtol=1e-6, atol=1e-6)

    print("KERNEL_OK")
</pallas_src>

<mosaic_0001>
module attributes {stable_mosaic.version = 11 : i64} {
  func.func @random_coefficients_kernel(%arg0: i32, %arg1: memref<8x128xf32, #tpu.memory_space<vmem>>, %arg2: memref<1x128xf32, #tpu.memory_space<vmem>>) attributes {dimension_semantics = [#tpu.dimension_semantics<parallel>], iteration_bounds = array<i64: 1>, scalar_prefetch = 0 : i64, scratch_operands = 0 : i64, tpu.core_type = #tpu.core_type<tc>, window_params = [{pipeline_mode = #tpu.pipeline_mode<synchronous>, transform_indices = @transform_0, window_bounds = array<i64: 8, 128>}, {transform_indices = @transform_1, window_bounds = array<i64: 1, 128>}]} {
    %c0 = arith.constant 0 : index
    %c0_0 = arith.constant 0 : index
    %0 = vector.load %arg1[%c0, %c0_0] : memref<8x128xf32, #tpu.memory_space<vmem>>, vector<1x128xf32>
    %c0_1 = arith.constant 0 : index
    %c0_2 = arith.constant 0 : index
    %1 = vector.load %arg2[%c0_1, %c0_2] : memref<1x128xf32, #tpu.memory_space<vmem>>, vector<1x128xf32>
    tpu.vector_store %arg2[%c0_1, %c0_2], %0 {strides = array<i32>} : memref<1x128xf32, #tpu.memory_space<vmem>>, vector<1x128xf32>,
    return
  }
  func.func @transform_0(%arg0: i32) -> (i32, i32) {
    %c0_i32 = arith.constant 0 : i32
    %c0_i32_0 = arith.constant 0 : i32
    %c0_i32_1 = arith.constant 0 : i32
    return %c0_i32, %c0_i32_0 : i32, i32
  }
  func.func @transform_1(%arg0: i32) -> (i32, i32) {
    %c0_i32 = arith.constant 0 : i32
    %c0_i32_0 = arith.constant 0 : i32
    return %arg0, %c0_i32 : i32, i32
  }
}

</mosaic_0001>

<bundles_post_ra>
// kernel: tpu_custom_call.1
= control target key start
LH: loop header
LB: loop body
LE: loop exit
PB: predicated region body
PF: predicated region fallthrough
CT: control target
= control target key end

     0   :  { %6 = vsyncpa [#allocation3], 0  ;;  %s124_s0 = inlined_call_operand.hbm [shape: f32[8,128], index: 0, kind: input, shape index: {}]   ;;  %s125_s1 = inlined_call_operand.hbm [shape: f32[1,128], index: 1, kind: output, shape index: {}]  }
   0x1   :  { %7 = vsyncpa [#allocation4], 0  ;;  %s88_s6 = smov [#allocation2]   ;;  %s40_s10 = scalar_lea.hbm %s124_s0, 128 }
   0x2   :  { %s14_s7 = sshll.u32 %s88_s6, 4  ;;  %p41_p0 = scmp.ne.s32.totalorder %s124_s0, %s40_s10  ;;  %s15_s7 = int_to_ptr.vmem [resolvable:$true] %s14_s7 }
   0x3   :  { %p44_p1 = scmp.lt.u32.totalorder %s40_s10, %s124_s0 }
   0x5   :  { %p46_p2 = pnand %p44_p1, %p41_p0 }
   0x7   :  { %49 = shalt.err (!%p46_p2)
}
   0x8   :  { %s50_s15 = scalar_lea.vmem %s15_s7, 128  ;;  %p55_p4 = scmp.lt.s32.totalorder %s15_s7, %s15_s7 }
   0x9   :  { %p51_p3 = scmp.ne.s32.totalorder %s15_s7, %s50_s15  ;;  %p56_p5 = scmp.lt.s32.totalorder %s50_s15, %s50_s15 }
   0xb   :  { %p57_p6 = por %p56_p5, %p55_p4 }
   0xd   :  { %p58_p7 = pnand %p57_p6, %p51_p3 }
   0xf   :  { %61 = shalt.err (!%p58_p7)
}
  0x10   :  { %17 = dma.hbm_to_vmem [thread:$0]  %s124_s0, 128, %s15_s7, [#allocation3]  }
  0x11   :  { %84 = dma.done.wait [#allocation3], 128  }
  0x12   :  { %85 = vsyncadd [#allocation3], 4294967168  ;;  %s89_s18 = smov [#allocation5]   ;;  %v21_v0 = vld [vmem:[#allocation2] sm:$0x1] }
  0x13   :  { %s29_s19 = sshll.u32 %s89_s18, 4  ;;  %22 = vst [vmem:[#allocation5] sm:$0x1] %v21_v0  ;;  %s30_s19 = int_to_ptr.vmem [resolvable:$true] %s29_s19 }
  0x14   :  { %s62_s20 = scalar_lea.vmem %s30_s19, 16  ;;  %s66_s21 = scalar_lea.vmem %s30_s19, 32 }
  0x15   :  { %p63_p8 = scmp.ne.s32.totalorder %s30_s19, %s62_s20  ;;  %p67_p9 = scmp.lt.s32.totalorder %s30_s19, %s30_s19 }
  0x16   :  { %p68_p10 = scmp.lt.s32.totalorder %s66_s21, %s62_s20 }
  0x18   :  { %p69_p11 = por %p68_p10, %p67_p9 }
  0x1a   :  { %p70_p12 = pnand %p69_p11, %p63_p8 }
  0x1c   :  { %73 = shalt.err (!%p70_p12)
}
  0x1d   :  { %s74_s24 = scalar_lea.hbm %s125_s1, 16 }
  0x1e   :  { %p75_p13 = scmp.ne.s32.totalorder %s125_s1, %s74_s24  ;;  %p78_p0 = scmp.lt.u32.totalorder %s74_s24, %s125_s1 }
  0x20   :  { %p80_p1 = pnand %p78_p0, %p75_p13 }
  0x22   :  { %83 = shalt.err (!%p80_p1)
}
  0x23   :  { %32 = dma.vmem_to_hbm [thread:$0]  %s30_s19, 16, %s125_s1, [#allocation4]  }
  0x24   :  { %86 = dma.done.wait [#allocation4], 16  }
  0x25   :  { %87 = vsyncadd [#allocation4], 4294967280 }
  0x26   :  { %36 = vsyncpa [#allocation3], 1 }
  0x27   :  { %37 = vsyncpa [#allocation4], 1 }

</bundles_post_ra>
